<compile_context>
chip_gen: v6e
topology: v6e:2x2x1
jax: 0.10.0
libtpu: 0.0.40
codegen_flags: <defaults>
</compile_context>

<pallas_src>
import functools

import jax
import jax.numpy as jnp
from jax.experimental import pallas as pl
from jax.experimental.pallas import tpu as pltpu

_LANE = 128


def _round_up(n, m):
    return ((n + m - 1) // m) * m


def rnn_cell_kernel(comb_ref, w_ref, b_ref, slab_ref, *, hidden_size, out_channel):
    """One fused MXU matmul -> lane-dense slab [ new_h | log_softmax(logits) | 0-pad ]."""
    comb = comb_ref[...]                                             # (B, fan_in) f32
    y = jnp.dot(comb, w_ref[...], preferred_element_type=jnp.float32) + b_ref[...]

    n_pad = y.shape[1]
    col = jax.lax.broadcasted_iota(jnp.int32, (1, n_pad), 1)
    is_logit = (col >= hidden_size) & (col < hidden_size + out_channel)

    # LogSoftmax over the real logit lanes only; padded / hidden lanes masked to -inf
    # so they contribute nothing to the max or the denominator.
    masked = jnp.where(is_logit, y, jnp.float32(-jnp.inf))
    m = jnp.max(masked, axis=1, keepdims=True)
    shifted = masked - m
    lse = jnp.log(jnp.sum(jnp.exp(shifted), axis=1, keepdims=True))
    log_probs = shifted - lse

    # Single lane-dense store: lanes [0,H) carry new_h, lanes [H,H+Cout) carry the
    # log-softmax output, remaining pad lanes carry zeros (sliced away outside).
    slab_ref[...] = jnp.where(is_logit, log_probs, y).astype(slab_ref.dtype)


def prepare_params(w_i2h, b_i2h, w_i2o, b_i2o):
    """One-time weight fusion (call OUTSIDE the step loop).

    w_i2h: (H, Cin+H), b_i2h: (H,)   -- PyTorch Linear layout (out, in)
    w_i2o: (Cout, Cin+H), b_i2o: (Cout,)
    Returns (w_cat, b_cat, H, Cout) with
      w_cat: (Cin+H, Npad) f32, columns [0,H)=i2h.T, [H,H+Cout)=i2o.T, rest zero
      b_cat: (1, Npad) f32 laid out the same way.
    """
    hidden_size, _fan_in = w_i2h.shape
    out_channel = w_i2o.shape[0]
    n = hidden_size + out_channel
    n_pad = _round_up(n, _LANE)

    w_cat = jnp.zeros((_fan_in, n_pad), jnp.float32)
    w_cat = w_cat.at[:, :hidden_size].set(w_i2h.T.astype(jnp.float32))
    w_cat = w_cat.at[:, hidden_size:n].set(w_i2o.T.astype(jnp.float32))

    b_cat = jnp.zeros((1, n_pad), jnp.float32)
    b_cat = b_cat.at[0, :hidden_size].set(b_i2h.astype(jnp.float32))
    b_cat = b_cat.at[0, hidden_size:n].set(b_i2o.astype(jnp.float32))
    return w_cat, b_cat, hidden_size, out_channel


@functools.partial(jax.jit, static_argnames=("hidden_size", "out_channel"))
def rnn_cell_step(x, h, w_cat, b_cat, *, hidden_size, out_channel):
    """x: (B, Cin), h: (B, H). Returns (log_softmax_output (B, Cout), new_hidden (B, H))."""
    batch = x.shape[0]
    n_pad = w_cat.shape[1]

    # torch.cat((input, hidden), 1) -- data-dependent per step, done in plain JAX glue.
    comb = jnp.concatenate([x.astype(jnp.float32), h.astype(jnp.float32)], axis=1)

    kernel = functools.partial(rnn_cell_kernel,
                               hidden_size=hidden_size, out_channel=out_channel)
    slab = pl.pallas_call(
        kernel,
        out_shape=jax.ShapeDtypeStruct((batch, n_pad), jnp.float32),
        in_specs=[pl.BlockSpec(memory_space=pltpu.MemorySpace.VMEM)] * 3,
        out_specs=pl.BlockSpec(memory_space=pltpu.MemorySpace.VMEM),
    )(comb, w_cat, b_cat)

    new_h = slab[:, :hidden_size].astype(x.dtype)
    out = slab[:, hidden_size:hidden_size + out_channel].astype(x.dtype)
    return out, new_h


def _ref(x, h, w_i2h, b_i2h, w_i2o, b_i2o):
    combined = jnp.concatenate([x, h], axis=1)
    new_h = combined @ w_i2h.T + b_i2h
    logits = combined @ w_i2o.T + b_i2o
    return jax.nn.log_softmax(logits, axis=1), new_h


if __name__ == "__main__":
    # Small shapes consistent with the module
    B, in_channel, out_channel, hidden_size = 2, 4, 8, 32

    key = jax.random.PRNGKey(0)
    k = jax.random.split(key, 6)
    fan_in = in_channel + hidden_size
    bound = 1.0 / jnp.sqrt(fan_in)

    # Deterministic parameter init (PyTorch-Linear-style uniform)
    w_i2h = jax.random.uniform(k[0], (hidden_size, fan_in), jnp.float32, -bound, bound)
    b_i2h = jax.random.uniform(k[1], (hidden_size,), jnp.float32, -bound, bound)
    w_i2o = jax.random.uniform(k[2], (out_channel, fan_in), jnp.float32, -bound, bound)
    b_i2o = jax.random.uniform(k[3], (out_channel,), jnp.float32, -bound, bound)

    x = jax.random.normal(k[4], (B, in_channel), jnp.float32)
    h = jnp.zeros((B, hidden_size), jnp.float32)  # inithidden()-style zeros (batched)

    # One-time weight fusion (outside the per-step path).
    w_cat, b_cat, H, Cout = prepare_params(w_i2h, b_i2h, w_i2o, b_i2o)

    out, new_h = rnn_cell_step(x, h, w_cat, b_cat, hidden_size=H, out_channel=Cout)
    jax.block_until_ready((out, new_h))

    out_ref, h_ref = _ref(x, h, w_i2h, b_i2h, w_i2o, b_i2o)
    assert jnp.allclose(out, out_ref, atol=1e-5), "output mismatch"
    assert jnp.allclose(new_h, h_ref, atol=1e-5), "hidden mismatch"

    print("KERNEL_OK")
</pallas_src>

<mosaic_0001>
module attributes {stable_mosaic.version = 11 : i64} {
  func.func @rnn_cell_kernel(%arg0: memref<2x36xf32, #tpu.memory_space<vmem>>, %arg1: memref<36x128xf32, #tpu.memory_space<vmem>>, %arg2: memref<1x128xf32, #tpu.memory_space<vmem>>, %arg3: memref<2x128xf32, #tpu.memory_space<vmem>>) attributes {dimension_semantics = [], scalar_prefetch = 0 : i64, scratch_operands = 0 : i64, tpu.core_type = #tpu.core_type<tc>} {
    %c0 = arith.constant 0 : index
    %c0_0 = arith.constant 0 : index
    %0 = vector.load %arg0[%c0, %c0_0] : memref<2x36xf32, #tpu.memory_space<vmem>>, vector<2x36xf32>
    %c0_1 = arith.constant 0 : index
    %c0_2 = arith.constant 0 : index
    %1 = vector.load %arg1[%c0_1, %c0_2] : memref<36x128xf32, #tpu.memory_space<vmem>>, vector<36x128xf32>
    %cst = arith.constant dense<0.000000e+00> : vector<2x128xf32>
    %2 = tpu.matmul %0, %1, %cst {dimension_numbers = #tpu.dot_dimension_numbers<[1], [0], [0], [1], [0, 0, 1, 1], [], []>} : vector<2x36xf32>, vector<36x128xf32>, vector<2x128xf32> -> vector<2x128xf32>
    %c0_3 = arith.constant 0 : index
    %c0_4 = arith.constant 0 : index
    %3 = vector.load %arg2[%c0_3, %c0_4] : memref<1x128xf32, #tpu.memory_space<vmem>>, vector<1x128xf32>
    %4 = vector.broadcast %3 : vector<1x128xf32> to vector<2x128xf32>
    %5 = arith.addf %2, %4 : vector<2x128xf32>
    %6 = tpu.iota {dimensions = array<i32: 1>} : vector<1x128xi32>
    %c32_i32 = arith.constant 32 : i32
    %7 = vector.broadcast %c32_i32 : i32 to vector<1x128xi32>
    %8 = arith.cmpi sge, %6, %7 : vector<1x128xi32>
    %c40_i32 = arith.constant 40 : i32
    %9 = vector.broadcast %c40_i32 : i32 to vector<1x128xi32>
    %10 = arith.cmpi slt, %6, %9 : vector<1x128xi32>
    %11 = arith.andi %8, %10 : vector<1x128xi1>
    %cst_5 = arith.constant 0xFF800000 : f32
    %12 = vector.shape_cast %11 : vector<1x128xi1> to vector<1x128xi1>
    %13 = vector.broadcast %12 : vector<1x128xi1> to vector<2x128xi1>
    %14 = vector.broadcast %cst_5 : f32 to vector<2x128xf32>
    %15 = arith.select %13, %5, %14 : vector<2x128xi1>, vector<2x128xf32>
    %cst_6 = arith.constant dense<0xFF800000> : vector<2xf32>
    %16 = vector.multi_reduction <maximumf>, %15, %cst_6 [1] : vector<2x128xf32> to vector<2xf32>
    %17 = vector.shape_cast %16 : vector<2xf32> to vector<2x1xf32>
    %18 = vector.broadcast %17 : vector<2x1xf32> to vector<2x128xf32>
    %19 = arith.subf %15, %18 : vector<2x128xf32>
    %20 = math.exp %19 : vector<2x128xf32>
    %cst_7 = arith.constant dense<0.000000e+00> : vector<2xf32>
    %21 = vector.multi_reduction <add>, %20, %cst_7 [1] : vector<2x128xf32> to vector<2xf32>
    %22 = vector.shape_cast %21 : vector<2xf32> to vector<2x1xf32>
    %23 = math.log %22 : vector<2x1xf32>
    %24 = vector.broadcast %23 : vector<2x1xf32> to vector<2x128xf32>
    %25 = arith.subf %19, %24 : vector<2x128xf32>
    %26 = vector.shape_cast %11 : vector<1x128xi1> to vector<1x128xi1>
    %27 = vector.broadcast %26 : vector<1x128xi1> to vector<2x128xi1>
    %28 = arith.select %27, %25, %5 : vector<2x128xi1>, vector<2x128xf32>
    %c0_8 = arith.constant 0 : index
    %c0_9 = arith.constant 0 : index
    %29 = vector.load %arg3[%c0_8, %c0_9] : memref<2x128xf32, #tpu.memory_space<vmem>>, vector<2x128xf32>
    tpu.vector_store %arg3[%c0_8, %c0_9], %28 {strides = array<i32>} : memref<2x128xf32, #tpu.memory_space<vmem>>, vector<2x128xf32>,
    return
  }
}

</mosaic_0001>

<bundles_post_ra>
// kernel: rnn_cell_step.1
= control target key start
LH: loop header
LB: loop body
LE: loop exit
PB: predicated region body
PF: predicated region fallthrough
CT: control target
= control target key end

     0   :  { %8 = vsyncpa [#allocation3], 0  ;;  %s200_s12 = smov [#allocation2]   ;;  %s245_s0 = inlined_call_operand.vmem [shape: f32[2,36], index: 0, kind: input, shape index: {}]   ;;  %s246_s1 = inlined_call_operand.hbm [shape: f32[36,128], index: 1, kind: input, shape index: {}]   ;;  %s247_s2 = inlined_call_operand.vmem [shape: f32[1,128], index: 2, kind: input, shape index: {}]   ;;  %s248_s3 = inlined_call_operand.vmem [shape: f32[2,128], index: 3, kind: output, shape index: {}]  }
   0x1   :  { %s16_s13 = sshll.u32 %s200_s12, 4  ;;  %s17_s13 = int_to_ptr.vmem [resolvable:$true] %s16_s13 }
   0x2   :  { %s186_s14 = scalar_lea.vmem %s17_s13, 640  ;;  %p191_p1 = scmp.lt.s32.totalorder %s17_s13, %s17_s13 }
   0x3   :  { %p187_p0 = scmp.ne.s32.totalorder %s17_s13, %s186_s14  ;;  %p192_p2 = scmp.lt.s32.totalorder %s186_s14, %s186_s14 }
   0x5   :  { %p193_p3 = por %p192_p2, %p191_p1 }
   0x7   :  { %p194_p4 = pnand %p193_p3, %p187_p0 }
   0x9   :  { %197 = shalt.err (!%p194_p4)
}
   0xa   :  { %s201_s15 = smov 128   ;;  %s202_s16 = smov 8  }
   0xb   :  { %22 = dma.hbm_to_vmem [thread:$0]  %s246_s1, 640, %s17_s13, [#allocation3], %s201_s15, %s201_s15, %s202_s16  }
   0xc   :  { %198 = dma.done.wait [#allocation3], 640  }
   0xd   :  { %199 = vsyncadd [#allocation3], 4294966656  ;;  %v203_v0 = vmov 0.0   ;;  %vm204_vm0 = vmmov 0   ;;  %vm45_vm1 = vcmask 1043456   ;;  %v32_v2 = vld [vmem:[#allocation2 + $0x18] sm:$0xff]  ;;  %v119_v7 = vlaneseq }
   0xe   :  { %156 = vmatprep.subr.mxu0 %v203_v0  ;;  %166 = vmatprep.mubr.msk.f32.mxu0 %vm204_vm0, %v203_v0  ;;  %v33_v1 = vld [vmem:[#allocation2 + $0x20] sm:$0xf]  ;;  %v31_v3 = vld [vmem:[#allocation2 + $0x10] sm:$0xff]  ;;  %v30_v4 = vld [vmem:[#allocation2 + $0x8] sm:$0xff]  ;;  %vm41_vm2 = vcmask 293888   ;;  %vm127_vm6 = vcmask 1041408  }
   0xf   :  { %157 = vmatpush3.msk.msra.mxu0 %vm45_vm1, %v33_v1  ;;  %v29_v5 = vld [vmem:[#allocation2] sm:$0xff]  ;;  %v120_v8 = vand.u32 127, %v119_v7 }
  0x10   :  { %158 = vmatprep.subr.mxu0 %v203_v0  ;;  %v28_v6 = vld [vmem:[%s245_s0] sm:$0x3] }
  0x11   :  { %159 = vmatpush3.msra.mxu0 %v32_v2  ;;  %vm121_vm3 = vcmp.ge.s32.totalorder %v120_v8, 32  ;;  %vm122_vm4 = vcmp.lt.s32.totalorder %v120_v8, 40  ;;  %v147_v9 = vld [vmem:[%s247_s2] ss:$0 sm:$0xff] }
  0x12   :  { %160 = vmatprep.subr.mxu0 %v203_v0  ;;  %vm234_vm5 = vmand %vm121_vm3, %vm122_vm4 }
  0x13   :  { %161 = vmatpush3.msra.mxu0 %v31_v3 }
  0x14   :  { %162 = vmatprep.subr.mxu0 %v203_v0 }
  0x15   :  { %163 = vmatpush3.msra.mxu0 %v30_v4 }
  0x16   :  { %164 = vmatprep.subr.mxu0 %v203_v0 }
  0x17   :  { %165 = vmatpush3.msra.mxu0 %v29_v5 }
  0x18   :  { %167 = vmatmul.mubr.msk.f32.vlgmr.msra.gmra.mxu0 %vm41_vm2, %v28_v6 }
  0xd8   :  { %v115_v10 = vpop.f32.mrf.mxu0 }
  0xd9   :  { %v116_v12 = vadd.f32 %v147_v9, %v115_v10 }
  0xda   :  { %v168_v13 = vpop.f32.mrf.mxu0 }
  0xdb   :  { %v126_v14 = vsel %vm234_vm5, %v116_v12, -inf }
  0xdc   :  { %v128_v15 = vsel %vm127_vm6, %v126_v14, -inf }
  0xdd   :  { %129 = vmax.xlane.f32.xlu0 %v128_v15 }
 0x166   :  { %v130_v16 = vpop.xlane.xlu0 %129 }
 0x167   :  { %v131_v17 = vsub.f32 %v126_v14, %v130_v16 }
 0x169   :  { %v132_v18 = vmul.f32 1.442695, %v131_v17 }
 0x16b   :  { %174 = vpow2.f32 %v132_v18 }
 0x178   :  { %v175_v19 = vpop.eup %174 }
 0x179   :  { %v134_v20 = vsel %vm127_vm6, %v175_v19, 0.0 }
 0x17a   :  { %135 = vadd.xlane.f32.xlu0 %v134_v20 }
 0x203   :  { %v136_v21 = vpop.xlane.xlu0 %135 }
 0x204   :  { %176 = vlog2.f32 %v136_v21 }
 0x211   :  { %v177_v22 = vpop.eup %176 }
 0x212   :  { %v138_v23 = vmul.f32 0.6931472, %v177_v22 }
 0x214   :  { %v139_v24 = vsub.f32 %v131_v17, %v138_v23 }
 0x216   :  { %v140_v25 = vsel %vm234_vm5, %v139_v24, %v116_v12 }
 0x217   :  { %141 = vst [vmem:[%s248_s3] sm:$0x3] %v140_v25 }
 0x218   :  { %146 = vsyncpa [#allocation3], 1 }

</bundles_post_ra>
